<compile_context>
chip_gen: v6e
topology: v6e:2x2x1
jax: 0.10.0
libtpu: 0.0.40
codegen_flags: <defaults>
</compile_context>

<pallas_src>
import functools

import jax
import jax.numpy as jnp
from jax.experimental import pallas as pl
from jax.experimental.pallas import tpu as pltpu


NEG_SLOPE = 0.01     # PyTorch F.leaky_relu default
LANES = 128          # lane width: hidden/output dims padded to a multiple of this
SUBLANES = 16        # bf16 packs 16 rows per sublane tile -> batch tile multiple of 16
TB_MAX = 2048        # max rows per grid step (working set stays a few MB << VMEM)


def _round_up(n, m):
    return ((n + m - 1) // m) * m


def _cdiv(a, b):
    return (a + b - 1) // b


def _pad2(a, rows, cols):
    return jnp.pad(a, ((0, rows - a.shape[0]), (0, cols - a.shape[1])))


def _leaky_relu(v):
    return jnp.where(v > 0, v, NEG_SLOPE * v)


def _choose_tile(B):
    """Tail-aware batch tile selection.

    * cap per-step rows at TB_MAX,
    * aim for >=2 grid steps once B >= 256 so both v7x TensorCores get work,
    * round TB to a multiple of 16 (bf16 sublane packing),
    * pick TB from cdiv(B, n_steps) so B_pad overshoot is bounded (no 1.7x waste
      when B sits just above a fixed tile boundary).
    """
    min_steps = 2 if B >= 256 else 1
    n_steps = max(_cdiv(B, TB_MAX), min_steps)
    tb = _round_up(_cdiv(B, n_steps), SUBLANES)
    n_steps = _cdiv(B, tb)
    return tb, n_steps


def dqn_kernel(x_ref,
               w1_ref, b1_ref,
               w2_ref, b2_ref,
               w3_ref, b3_ref,
               w4_ref, b4_ref,
               w5_ref, b5_ref,
               out_ref):
    # x_ref: (TB, in_dim) bf16. Weights bf16 (in, out), biases f32 (1, out).
    # bf16 MXU matmuls with f32 accumulation; elementwise in f32 on the VPU,
    # re-cast to bf16 only at the next dot's input. Output stored bf16, lane-dense.
    h = x_ref[...]
    for w_ref, b_ref in ((w1_ref, b1_ref), (w2_ref, b2_ref),
                         (w3_ref, b3_ref), (w4_ref, b4_ref)):
        z = jnp.dot(h, w_ref[...], preferred_element_type=jnp.float32) + b_ref[...]
        h = _leaky_relu(z).astype(jnp.bfloat16)
    y = jnp.dot(h, w5_ref[...], preferred_element_type=jnp.float32) + b5_ref[...]
    out_ref[...] = y.astype(out_ref.dtype)   # (TB, 128) bf16, unmasked vst


def prepare_params(params):
    """One-time padding + bf16 cast of the weights/biases (hoisted out of the forward).

    Input feature dim is left unpadded; hidden/output dims are padded to 128 lanes.
    Zero padding is exact: zero weight rows/cols + zero bias lanes stay 0 through
    leaky_relu and contribute nothing downstream.
    """
    ws = [params[f"w{i}"] for i in range(1, 6)]
    bs = [params[f"b{i}"] for i in range(1, 6)]
    in_dim = ws[0].shape[0]
    out_dim = ws[-1].shape[1]
    dims = [in_dim] + [w.shape[1] for w in ws]
    pdims = [in_dim] + [_round_up(d, LANES) for d in dims[1:]]

    flat = []
    for li in range(5):
        flat.append(_pad2(ws[li], pdims[li], pdims[li + 1]).astype(jnp.bfloat16))
        flat.append(_pad2(bs[li], 1, pdims[li + 1]).astype(jnp.float32))
    meta = {"pdims": tuple(pdims), "out_dim": out_dim}
    return tuple(flat), meta


def deep_q_network(x, flat_params, meta):
    """x: (B, input_size) f32. flat_params/meta from prepare_params. Returns (B, out) f32."""
    B, in_dim = x.shape
    pdims = meta["pdims"]
    out_dim = meta["out_dim"]
    assert in_dim == pdims[0], "input feature dim mismatch with prepared params"

    tb, n_steps = _choose_tile(B)
    B_pad = tb * n_steps

    # Only the batch rows are padded; feature dim stays at in_dim (no 8x read inflation).
    xp = _pad2(x, B_pad, in_dim).astype(jnp.bfloat16)

    in_specs = [pl.BlockSpec((tb, in_dim), lambda i: (i, 0))]
    for li in range(5):
        # Constant-index full-array specs: loaded once, resident across grid steps.
        in_specs.append(pl.BlockSpec((pdims[li], pdims[li + 1]), lambda i: (0, 0)))
        in_specs.append(pl.BlockSpec((1, pdims[li + 1]), lambda i: (0, 0)))
    out_spec = pl.BlockSpec((tb, pdims[5]), lambda i: (i, 0))

    out = pl.pallas_call(
        dqn_kernel,
        out_shape=jax.ShapeDtypeStruct((B_pad, pdims[5]), jnp.bfloat16),
        grid=(n_steps,),
        in_specs=in_specs,
        out_specs=out_spec,
        compiler_params=pltpu.CompilerParams(
            dimension_semantics=("parallel",)),
    )(xp, *flat_params)

    # Tiny (B, out_dim) slice; restore f32 for consumers (negligible cost).
    return out[:B, :out_dim].astype(jnp.float32)


def init_params(key, input_size, output_size):
    """Deterministic synthetic init (PyTorch-style uniform ranges), weights as (in, out)."""
    dims = [(input_size, 64), (64, 64), (64, 128), (128, 64), (64, output_size)]
    params = {}
    for i, (fan_in, fan_out) in enumerate(dims, start=1):
        key, kw, kb = jax.random.split(key, 3)
        bound = 1.0 / (fan_in ** 0.5)
        params[f"w{i}"] = jax.random.uniform(
            kw, (fan_in, fan_out), jnp.float32, -bound, bound)
        params[f"b{i}"] = jax.random.uniform(
            kb, (1, fan_out), jnp.float32, -bound, bound)
    return params


def reference_forward_f32(x, params):
    """Pure-f32 PyTorch-equivalent forward."""
    h = x
    for i in range(1, 5):
        h = jnp.dot(h, params[f"w{i}"]) + params[f"b{i}"]
        h = jnp.where(h > 0, h, NEG_SLOPE * h)
    return jnp.dot(h, params["w5"]) + params["b5"]


def reference_forward_bf16(x, params):
    """Mirrors the kernel numerics: bf16 matmul operands, f32 accumulate, bf16 output store."""
    h = x.astype(jnp.bfloat16)
    for i in range(1, 5):
        z = jnp.dot(h, params[f"w{i}"].astype(jnp.bfloat16),
                    preferred_element_type=jnp.float32) + params[f"b{i}"]
        h = jnp.where(z > 0, z, NEG_SLOPE * z).astype(jnp.bfloat16)
    y = jnp.dot(h, params["w5"].astype(jnp.bfloat16),
                preferred_element_type=jnp.float32) + params["b5"]
    return y.astype(jnp.bfloat16).astype(jnp.float32)


def _check(out, x, params):
    ref_bf16 = reference_forward_bf16(x, params)
    assert jnp.allclose(out, ref_bf16, atol=1e-2, rtol=1e-2), \
        "mismatch vs bf16-matched reference"
    ref_f32 = reference_forward_f32(x, params)
    assert jnp.allclose(out, ref_f32, atol=6e-2, rtol=6e-2), \
        "mismatch vs f32 reference"


if __name__ == "__main__":
    key = jax.random.PRNGKey(0)
    input_size, output_size, batch = 16, 4, 8

    key, kx, kp, kx2 = jax.random.split(key, 4)
    x = jax.random.normal(kx, (batch, input_size), jnp.float32)
    params = init_params(kp, input_size, output_size)

    # One-time param preparation (padding + bf16 cast hoisted out of the forward).
    flat_params, meta = prepare_params(params)

    fwd = jax.jit(functools.partial(deep_q_network, meta=meta))

    # Small batch (single-step grid).
    out = jax.block_until_ready(fwd(x, flat_params))
    assert out.shape == (batch, output_size)
    _check(out, x, params)

    # Larger batch exercising the tail-aware multi-step ("parallel") grid path.
    batch2 = 272   # -> TB=144, 2 grid steps, B_pad=288
    x2 = jax.random.normal(kx2, (batch2, input_size), jnp.float32)
    out2 = jax.block_until_ready(fwd(x2, flat_params))
    assert out2.shape == (batch2, output_size)
    _check(out2, x2, params)

    print("KERNEL_OK")
</pallas_src>

<mosaic_0001>
module attributes {stable_mosaic.version = 11 : i64} {
  func.func @dqn_kernel(%arg0: i32, %arg1: memref<16x16xbf16, #tpu.memory_space<vmem>>, %arg2: memref<16x128xbf16, #tpu.memory_space<vmem>>, %arg3: memref<1x128xf32, #tpu.memory_space<vmem>>, %arg4: memref<128x128xbf16, #tpu.memory_space<vmem>>, %arg5: memref<1x128xf32, #tpu.memory_space<vmem>>, %arg6: memref<128x128xbf16, #tpu.memory_space<vmem>>, %arg7: memref<1x128xf32, #tpu.memory_space<vmem>>, %arg8: memref<128x128xbf16, #tpu.memory_space<vmem>>, %arg9: memref<1x128xf32, #tpu.memory_space<vmem>>, %arg10: memref<128x128xbf16, #tpu.memory_space<vmem>>, %arg11: memref<1x128xf32, #tpu.memory_space<vmem>>, %arg12: memref<16x128xbf16, #tpu.memory_space<vmem>>) attributes {dimension_semantics = [#tpu.dimension_semantics<parallel>], iteration_bounds = array<i64: 1>, scalar_prefetch = 0 : i64, scratch_operands = 0 : i64, tpu.core_type = #tpu.core_type<tc>, window_params = [{transform_indices = @transform_0, window_bounds = array<i64: 16, 16>}, {pipeline_mode = #tpu.pipeline_mode<synchronous>, transform_indices = @transform_1, window_bounds = array<i64: 16, 128>}, {pipeline_mode = #tpu.pipeline_mode<synchronous>, transform_indices = @transform_2, window_bounds = array<i64: 1, 128>}, {pipeline_mode = #tpu.pipeline_mode<synchronous>, transform_indices = @transform_3, window_bounds = array<i64: 128, 128>}, {pipeline_mode = #tpu.pipeline_mode<synchronous>, transform_indices = @transform_4, window_bounds = array<i64: 1, 128>}, {pipeline_mode = #tpu.pipeline_mode<synchronous>, transform_indices = @transform_5, window_bounds = array<i64: 128, 128>}, {pipeline_mode = #tpu.pipeline_mode<synchronous>, transform_indices = @transform_6, window_bounds = array<i64: 1, 128>}, {pipeline_mode = #tpu.pipeline_mode<synchronous>, transform_indices = @transform_7, window_bounds = array<i64: 128, 128>}, {pipeline_mode = #tpu.pipeline_mode<synchronous>, transform_indices = @transform_8, window_bounds = array<i64: 1, 128>}, {pipeline_mode = #tpu.pipeline_mode<synchronous>, transform_indices = @transform_9, window_bounds = array<i64: 128, 128>}, {pipeline_mode = #tpu.pipeline_mode<synchronous>, transform_indices = @transform_10, window_bounds = array<i64: 1, 128>}, {transform_indices = @transform_11, window_bounds = array<i64: 16, 128>}]} {
    %c0 = arith.constant 0 : index
    %c0_0 = arith.constant 0 : index
    %0 = vector.load %arg1[%c0, %c0_0] : memref<16x16xbf16, #tpu.memory_space<vmem>>, vector<16x16xbf16>
    %c0_1 = arith.constant 0 : index
    %c0_2 = arith.constant 0 : index
    %1 = vector.load %arg2[%c0_1, %c0_2] : memref<16x128xbf16, #tpu.memory_space<vmem>>, vector<16x128xbf16>
    %cst = arith.constant dense<0.000000e+00> : vector<16x128xf32>
    %2 = tpu.matmul %0, %1, %cst {dimension_numbers = #tpu.dot_dimension_numbers<[1], [0], [0], [1], [0, 0, 1, 1], [], []>} : vector<16x16xbf16>, vector<16x128xbf16>, vector<16x128xf32> -> vector<16x128xf32>
    %c0_3 = arith.constant 0 : index
    %c0_4 = arith.constant 0 : index
    %3 = vector.load %arg3[%c0_3, %c0_4] : memref<1x128xf32, #tpu.memory_space<vmem>>, vector<1x128xf32>
    %4 = vector.broadcast %3 : vector<1x128xf32> to vector<16x128xf32>
    %5 = arith.addf %2, %4 : vector<16x128xf32>
    %cst_5 = arith.constant 0.000000e+00 : f32
    %6 = vector.broadcast %cst_5 : f32 to vector<16x128xf32>
    %7 = arith.cmpf ogt, %5, %6 : vector<16x128xf32>
    %cst_6 = arith.constant 0.00999999977 : f32
    %8 = vector.broadcast %cst_6 : f32 to vector<16x128xf32>
    %9 = arith.mulf %8, %5 : vector<16x128xf32>
    %10 = arith.select %7, %5, %9 : vector<16x128xi1>, vector<16x128xf32>
    %11 = arith.truncf %10 : vector<16x128xf32> to vector<16x128xbf16>
    %c0_7 = arith.constant 0 : index
    %c0_8 = arith.constant 0 : index
    %12 = vector.load %arg4[%c0_7, %c0_8] : memref<128x128xbf16, #tpu.memory_space<vmem>>, vector<128x128xbf16>
    %cst_9 = arith.constant dense<0.000000e+00> : vector<16x128xf32>
    %13 = tpu.matmul %11, %12, %cst_9 {dimension_numbers = #tpu.dot_dimension_numbers<[1], [0], [0], [1], [0, 0, 1, 1], [], []>} : vector<16x128xbf16>, vector<128x128xbf16>, vector<16x128xf32> -> vector<16x128xf32>
    %c0_10 = arith.constant 0 : index
    %c0_11 = arith.constant 0 : index
    %14 = vector.load %arg5[%c0_10, %c0_11] : memref<1x128xf32, #tpu.memory_space<vmem>>, vector<1x128xf32>
    %15 = vector.broadcast %14 : vector<1x128xf32> to vector<16x128xf32>
    %16 = arith.addf %13, %15 : vector<16x128xf32>
    %cst_12 = arith.constant 0.000000e+00 : f32
    %17 = vector.broadcast %cst_12 : f32 to vector<16x128xf32>
    %18 = arith.cmpf ogt, %16, %17 : vector<16x128xf32>
    %cst_13 = arith.constant 0.00999999977 : f32
    %19 = vector.broadcast %cst_13 : f32 to vector<16x128xf32>
    %20 = arith.mulf %19, %16 : vector<16x128xf32>
    %21 = arith.select %18, %16, %20 : vector<16x128xi1>, vector<16x128xf32>
    %22 = arith.truncf %21 : vector<16x128xf32> to vector<16x128xbf16>
    %c0_14 = arith.constant 0 : index
    %c0_15 = arith.constant 0 : index
    %23 = vector.load %arg6[%c0_14, %c0_15] : memref<128x128xbf16, #tpu.memory_space<vmem>>, vector<128x128xbf16>
    %cst_16 = arith.constant dense<0.000000e+00> : vector<16x128xf32>
    %24 = tpu.matmul %22, %23, %cst_16 {dimension_numbers = #tpu.dot_dimension_numbers<[1], [0], [0], [1], [0, 0, 1, 1], [], []>} : vector<16x128xbf16>, vector<128x128xbf16>, vector<16x128xf32> -> vector<16x128xf32>
    %c0_17 = arith.constant 0 : index
    %c0_18 = arith.constant 0 : index
    %25 = vector.load %arg7[%c0_17, %c0_18] : memref<1x128xf32, #tpu.memory_space<vmem>>, vector<1x128xf32>
    %26 = vector.broadcast %25 : vector<1x128xf32> to vector<16x128xf32>
    %27 = arith.addf %24, %26 : vector<16x128xf32>
    %cst_19 = arith.constant 0.000000e+00 : f32
    %28 = vector.broadcast %cst_19 : f32 to vector<16x128xf32>
    %29 = arith.cmpf ogt, %27, %28 : vector<16x128xf32>
    %cst_20 = arith.constant 0.00999999977 : f32
    %30 = vector.broadcast %cst_20 : f32 to vector<16x128xf32>
    %31 = arith.mulf %30, %27 : vector<16x128xf32>
    %32 = arith.select %29, %27, %31 : vector<16x128xi1>, vector<16x128xf32>
    %33 = arith.truncf %32 : vector<16x128xf32> to vector<16x128xbf16>
    %c0_21 = arith.constant 0 : index
    %c0_22 = arith.constant 0 : index
    %34 = vector.load %arg8[%c0_21, %c0_22] : memref<128x128xbf16, #tpu.memory_space<vmem>>, vector<128x128xbf16>
    %cst_23 = arith.constant dense<0.000000e+00> : vector<16x128xf32>
    %35 = tpu.matmul %33, %34, %cst_23 {dimension_numbers = #tpu.dot_dimension_numbers<[1], [0], [0], [1], [0, 0, 1, 1], [], []>} : vector<16x128xbf16>, vector<128x128xbf16>, vector<16x128xf32> -> vector<16x128xf32>
    %c0_24 = arith.constant 0 : index
    %c0_25 = arith.constant 0 : index
    %36 = vector.load %arg9[%c0_24, %c0_25] : memref<1x128xf32, #tpu.memory_space<vmem>>, vector<1x128xf32>
    %37 = vector.broadcast %36 : vector<1x128xf32> to vector<16x128xf32>
    %38 = arith.addf %35, %37 : vector<16x128xf32>
    %cst_26 = arith.constant 0.000000e+00 : f32
    %39 = vector.broadcast %cst_26 : f32 to vector<16x128xf32>
    %40 = arith.cmpf ogt, %38, %39 : vector<16x128xf32>
    %cst_27 = arith.constant 0.00999999977 : f32
    %41 = vector.broadcast %cst_27 : f32 to vector<16x128xf32>
    %42 = arith.mulf %41, %38 : vector<16x128xf32>
    %43 = arith.select %40, %38, %42 : vector<16x128xi1>, vector<16x128xf32>
    %44 = arith.truncf %43 : vector<16x128xf32> to vector<16x128xbf16>
    %c0_28 = arith.constant 0 : index
    %c0_29 = arith.constant 0 : index
    %45 = vector.load %arg10[%c0_28, %c0_29] : memref<128x128xbf16, #tpu.memory_space<vmem>>, vector<128x128xbf16>
    %cst_30 = arith.constant dense<0.000000e+00> : vector<16x128xf32>
    %46 = tpu.matmul %44, %45, %cst_30 {dimension_numbers = #tpu.dot_dimension_numbers<[1], [0], [0], [1], [0, 0, 1, 1], [], []>} : vector<16x128xbf16>, vector<128x128xbf16>, vector<16x128xf32> -> vector<16x128xf32>
    %c0_31 = arith.constant 0 : index
    %c0_32 = arith.constant 0 : index
    %47 = vector.load %arg11[%c0_31, %c0_32] : memref<1x128xf32, #tpu.memory_space<vmem>>, vector<1x128xf32>
    %48 = vector.broadcast %47 : vector<1x128xf32> to vector<16x128xf32>
    %49 = arith.addf %46, %48 : vector<16x128xf32>
    %50 = arith.truncf %49 : vector<16x128xf32> to vector<16x128xbf16>
    %c0_33 = arith.constant 0 : index
    %c0_34 = arith.constant 0 : index
    %51 = vector.load %arg12[%c0_33, %c0_34] : memref<16x128xbf16, #tpu.memory_space<vmem>>, vector<16x128xbf16>
    tpu.vector_store %arg12[%c0_33, %c0_34], %50 {strides = array<i32>} : memref<16x128xbf16, #tpu.memory_space<vmem>>, vector<16x128xbf16>,
    return
  }
  func.func @transform_0(%arg0: i32) -> (i32, i32) {
    %c0_i32 = arith.constant 0 : i32
    %c0_i32_0 = arith.constant 0 : i32
    return %arg0, %c0_i32 : i32, i32
  }
  func.func @transform_1(%arg0: i32) -> (i32, i32) {
    %c0_i32 = arith.constant 0 : i32
    %c0_i32_0 = arith.constant 0 : i32
    %c0_i32_1 = arith.constant 0 : i32
    return %c0_i32, %c0_i32_0 : i32, i32
  }
  func.func @transform_2(%arg0: i32) -> (i32, i32) {
    %c0_i32 = arith.constant 0 : i32
    %c0_i32_0 = arith.constant 0 : i32
    %c0_i32_1 = arith.constant 0 : i32
    return %c0_i32, %c0_i32_0 : i32, i32
  }
  func.func @transform_3(%arg0: i32) -> (i32, i32) {
    %c0_i32 = arith.constant 0 : i32
    %c0_i32_0 = arith.constant 0 : i32
    %c0_i32_1 = arith.constant 0 : i32
    return %c0_i32, %c0_i32_0 : i32, i32
  }
  func.func @transform_4(%arg0: i32) -> (i32, i32) {
    %c0_i32 = arith.constant 0 : i32
    %c0_i32_0 = arith.constant 0 : i32
    %c0_i32_1 = arith.constant 0 : i32
    return %c0_i32, %c0_i32_0 : i32, i32
  }
  func.func @transform_5(%arg0: i32) -> (i32, i32) {
    %c0_i32 = arith.constant 0 : i32
    %c0_i32_0 = arith.constant 0 : i32
    %c0_i32_1 = arith.constant 0 : i32
    return %c0_i32, %c0_i32_0 : i32, i32
  }
  func.func @transform_6(%arg0: i32) -> (i32, i32) {
    %c0_i32 = arith.constant 0 : i32
    %c0_i32_0 = arith.constant 0 : i32
    %c0_i32_1 = arith.constant 0 : i32
    return %c0_i32, %c0_i32_0 : i32, i32
  }
  func.func @transform_7(%arg0: i32) -> (i32, i32) {
    %c0_i32 = arith.constant 0 : i32
    %c0_i32_0 = arith.constant 0 : i32
    %c0_i32_1 = arith.constant 0 : i32
    return %c0_i32, %c0_i32_0 : i32, i32
  }
  func.func @transform_8(%arg0: i32) -> (i32, i32) {
    %c0_i32 = arith.constant 0 : i32
    %c0_i32_0 = arith.constant 0 : i32
    %c0_i32_1 = arith.constant 0 : i32
    return %c0_i32, %c0_i32_0 : i32, i32
  }
  func.func @transform_9(%arg0: i32) -> (i32, i32) {
    %c0_i32 = arith.constant 0 : i32
    %c0_i32_0 = arith.constant 0 : i32
    %c0_i32_1 = arith.constant 0 : i32
    return %c0_i32, %c0_i32_0 : i32, i32
  }
  func.func @transform_10(%arg0: i32) -> (i32, i32) {
    %c0_i32 = arith.constant 0 : i32
    %c0_i32_0 = arith.constant 0 : i32
    %c0_i32_1 = arith.constant 0 : i32
    return %c0_i32, %c0_i32_0 : i32, i32
  }
  func.func @transform_11(%arg0: i32) -> (i32, i32) {
    %c0_i32 = arith.constant 0 : i32
    %c0_i32_0 = arith.constant 0 : i32
    return %arg0, %c0_i32 : i32, i32
  }
}

</mosaic_0001>

<bundles_post_ra>
// kernel: deep_q_network.1
= control target key start
LH: loop header
LB: loop body
LE: loop exit
PB: predicated region body
PF: predicated region fallthrough
CT: control target
= control target key end

     0   :  { %16 = vsyncpa [#allocation3], 0  ;;  %s1114_s0 = inlined_call_operand.vmem [shape: bf16[16,16], index: 0, kind: input, shape index: {}]   ;;  %s1115_s1 = inlined_call_operand.vmem [shape: bf16[16,128], index: 1, kind: input, shape index: {}]   ;;  %s1116_s2 = inlined_call_operand.vmem [shape: f32[1,128], index: 2, kind: input, shape index: {}]   ;;  %s1117_s3 = inlined_call_operand.hbm [shape: bf16[128,128], index: 3, kind: input, shape index: {}]   ;;  %s1118_s4 = inlined_call_operand.vmem [shape: f32[1,128], index: 4, kind: input, shape index: {}]   ;;  %s1119_s5 = inlined_call_operand.hbm [shape: bf16[128,128], index: 5, kind: input, shape index: {}]   ;;  %s1120_s6 = inlined_call_operand.vmem [shape: f32[1,128], index: 6, kind: input, shape index: {}]   ;;  %s1121_s7 = inlined_call_operand.hbm [shape: bf16[128,128], index: 7, kind: input, shape index: {}]   ;;  %s1122_s8 = inlined_call_operand.vmem [shape: f32[1,128], index: 8, kind: input, shape index: {}]   ;;  %s1123_s9 = inlined_call_operand.hbm [shape: bf16[128,128], index: 9, kind: input, shape index: {}]   ;;  %s1124_s10 = inlined_call_operand.vmem [shape: f32[1,128], index: 10, kind: input, shape index: {}]   ;;  %s1125_s11 = inlined_call_operand.vmem [shape: bf16[16,128], index: 11, kind: output, shape index: {}]  }
   0x1   :  { %17 = vsyncpa [#allocation5], 0 }
   0x2   :  { %18 = vsyncpa [#allocation8], 0  ;;  %s955_s17 = smov [#allocation4]   ;;  %s956_s19 = smov [#allocation2]  }
   0x3   :  { %s44_s18 = sshll.u32 %s955_s17, 4  ;;  %s30_s20 = sshll.u32 %s956_s19, 4  ;;  %s45_s18 = int_to_ptr.vmem [resolvable:$true] %s44_s18  ;;  %s31_s20 = int_to_ptr.vmem [resolvable:$true] %s30_s20 }
   0x4   :  { %s877_s21 = scalar_lea.vmem %s45_s18, 1024  ;;  %p882_p1 = scmp.lt.s32.totalorder %s45_s18, %s45_s18 }
   0x5   :  { %p878_p0 = scmp.ne.s32.totalorder %s45_s18, %s877_s21  ;;  %p883_p2 = scmp.lt.s32.totalorder %s877_s21, %s877_s21 }
   0x7   :  { %p884_p3 = por %p883_p2, %p882_p1 }
   0x9   :  { %p885_p4 = pnand %p884_p3, %p878_p0 }
   0xb   :  { %888 = shalt.err (!%p885_p4)
}
   0xc   :  { %s957_s22 = smov 64   ;;  %s958_s23 = smov 4  }
   0xd   :  { %50 = dma.hbm_to_vmem [thread:$0]  %s1119_s5, 1024, %s45_s18, [#allocation5], %s957_s22, %s957_s22, %s958_s23  }
   0xe   :  { %s897_s26 = scalar_lea.vmem %s31_s20, 1024  ;;  %p902_p6 = scmp.lt.s32.totalorder %s31_s20, %s31_s20 }
   0xf   :  { %p898_p5 = scmp.ne.s32.totalorder %s31_s20, %s897_s26  ;;  %p903_p7 = scmp.lt.s32.totalorder %s897_s26, %s897_s26 }
  0x11   :  { %p904_p8 = por %p903_p7, %p902_p6 }
  0x13   :  { %p905_p9 = pnand %p904_p8, %p898_p5 }
  0x15   :  { %908 = shalt.err (!%p905_p9)
}
  0x16   :  { %36 = dma.hbm_to_vmem [thread:$0]  %s1117_s3, 1024, %s31_s20, [#allocation3], %s957_s22, %s957_s22, %s958_s23  }
  0x17   :  { %s959_s29 = smov [#allocation6]   ;;  %s960_s12 = smov [#allocation7]  }
  0x18   :  { %s58_s30 = sshll.u32 %s959_s29, 4  ;;  %s72_s13 = sshll.u32 %s960_s12, 4  ;;  %s59_s30 = int_to_ptr.vmem [resolvable:$true] %s58_s30  ;;  %s73_s13 = int_to_ptr.vmem [resolvable:$true] %s72_s13 }
  0x19   :  { %s917_s5 = scalar_lea.vmem %s59_s30, 1024  ;;  %p922_p11 = scmp.lt.s32.totalorder %s59_s30, %s59_s30 }
  0x1a   :  { %p918_p10 = scmp.ne.s32.totalorder %s59_s30, %s917_s5  ;;  %p923_p12 = scmp.lt.s32.totalorder %s917_s5, %s917_s5 }
  0x1c   :  { %p924_p13 = por %p923_p12, %p922_p11 }
  0x1e   :  { %p925_p0 = pnand %p924_p13, %p918_p10 }
  0x20   :  { %928 = shalt.err (!%p925_p0)
}
  0x21   :  { %64 = dma.hbm_to_vmem [thread:$0]  %s1121_s7, 1024, %s59_s30, [#allocation5], %s957_s22, %s957_s22, %s958_s23  }
  0x22   :  { %s937_s3 = scalar_lea.vmem %s73_s13, 1024  ;;  %p942_p2 = scmp.lt.s32.totalorder %s73_s13, %s73_s13 }
  0x23   :  { %p938_p1 = scmp.ne.s32.totalorder %s73_s13, %s937_s3  ;;  %p943_p3 = scmp.lt.s32.totalorder %s937_s3, %s937_s3 }
  0x25   :  { %p944_p4 = por %p943_p3, %p942_p2 }
  0x27   :  { %p945_p5 = pnand %p944_p4, %p938_p1 }
  0x29   :  { %948 = shalt.err (!%p945_p5)
}
  0x2a   :  { %78 = dma.hbm_to_vmem [thread:$0]  %s1123_s9, 1024, %s73_s13, [#allocation8], %s957_s22, %s957_s22, %s958_s23  }
  0x2b   :  { %949 = dma.done.wait [#allocation3], 1024  }
  0x2c   :  { %950 = vsyncadd [#allocation3], 4294966272 }
  0x2d   :  { %951 = dma.done.wait [#allocation5], 2048  }
  0x2e   :  { %952 = vsyncadd [#allocation5], 4294965248 }
  0x2f   :  { %953 = dma.done.wait [#allocation8], 1024  }
  0x30   :  { %954 = vsyncadd [#allocation8], 4294966272  ;;  %v961_v0 = vmov 0.0   ;;  %vm962_vm0 = vmmov 0   ;;  %v835_v1 = vld [vmem:[%s1115_s1] sm:$0xff]   ;;  %vm116_vm1 = vcmask 130048  }
  0x31   :  { %741 = vmatprep.subr.bf16.mxu0 %v961_v0  ;;  %743 = vmatprep.mubr.msk.bf16.mxu0 %vm962_vm0, %v961_v0  ;;  %v836_v2 = vld [vmem:[%s1114_s0] sm:$0xff]   ;;  %v837_v3 = vld [vmem:[#allocation2 + $0x38] sm:$0xff]   ;;  %v838_v4 = vld [vmem:[#allocation2 + $0x30] sm:$0xff]  }
  0x32   :  { %747 = vmatprep.subr.bf16.mxu1 %v961_v0  ;;  %763 = vmatprep.mubr.msk.bf16.mxu1 %vm962_vm0, %v961_v0  ;;  %v839_v5 = vld [vmem:[#allocation2 + $0x28] sm:$0xff]   ;;  %v840_v6 = vld [vmem:[#allocation2 + $0x20] sm:$0xff]   ;;  %v841_v7 = vld [vmem:[#allocation2 + $0x18] sm:$0xff]  }
  0x33   :  { %742 = vmatpush3.bf16.msra.mxu0 %v835_v1  ;;  %748 = vmatpush3.bf16.msra.mxu1 %v837_v3  ;;  %v842_v8 = vld [vmem:[#allocation2 + $0x10] sm:$0xff]   ;;  %v843_v9 = vld [vmem:[#allocation2 + $0x8] sm:$0xff]   ;;  %v844_v10 = vld [vmem:[#allocation2] sm:$0xff]  }
  0x34   :  { %767 = vmatprep.subr.bf16.mxu0 %v961_v0  ;;  %749 = vmatprep.subr.bf16.mxu1 %v961_v0  ;;  %v845_v11 = vld [vmem:[#allocation4 + $0x38] sm:$0xff]   ;;  %v846_v12 = vld [vmem:[#allocation4 + $0x30] sm:$0xff]   ;;  %v847_v13 = vld [vmem:[#allocation4 + $0x28] sm:$0xff]  }
  0x35   :  { %v848_v14 = vld [vmem:[#allocation4 + $0x20] sm:$0xff]   ;;  %v849_v15 = vld [vmem:[#allocation4 + $0x18] sm:$0xff]   ;;  %v850_v28 = vld [vmem:[#allocation4 + $0x10] sm:$0xff]  }
  0x36   :  { %744 = vmatmul.mubr.msk.bf16.vlgmr.msra.gmra.mxu0 %vm116_vm1, %v836_v2  ;;  %v654_v16 = vld [vmem:[%s1116_s2] ss:$0 sm:$0xff]  ;;  %v851_v29 = vld [vmem:[#allocation4 + $0x8] sm:$0xff]   ;;  %v853_v31 = vld [vmem:[#allocation6 + $0x38] sm:$0xff]  }
  0x37   :  { %783 = vmatprep.mubr.msk.bf16.mxu0 %vm962_vm0, %v961_v0  ;;  %750 = vmatpush3.bf16.msra.mxu1 %v838_v4  ;;  %v852_v30 = vld [vmem:[#allocation4] sm:$0xff]   ;;  %v854_v32 = vld [vmem:[#allocation6 + $0x30] sm:$0xff]   ;;  %v855_v33 = vld [vmem:[#allocation6 + $0x28] sm:$0xff]  }
  0x38   :  { %751 = vmatprep.subr.bf16.mxu1 %v961_v0  ;;  %768 = vmatpush3.bf16.msra.mxu0 %v845_v11  ;;  %v856_v34 = vld [vmem:[#allocation6 + $0x20] sm:$0xff]   ;;  %v857_v35 = vld [vmem:[#allocation6 + $0x18] sm:$0xff]   ;;  %v858_v48 = vld [vmem:[#allocation6 + $0x10] sm:$0xff]  }
  0x39   :  { %769 = vmatprep.subr.bf16.mxu0 %v961_v0  ;;  %v658_v36 = vld [vmem:[%s1118_s4] ss:$0 sm:$0xff]  ;;  %v859_v49 = vld [vmem:[#allocation6 + $0x8] sm:$0xff]   ;;  %v861_v51 = vld [vmem:[#allocation7 + $0x38] sm:$0xff]  }
  0x3a   :  { %v860_v50 = vld [vmem:[#allocation6] sm:$0xff]   ;;  %v862_v52 = vld [vmem:[#allocation7 + $0x30] sm:$0xff]   ;;  %v863_v53 = vld [vmem:[#allocation7 + $0x28] sm:$0xff]  }
  0x3b   :  { %752 = vmatpush3.bf16.msra.mxu1 %v839_v5  ;;  %v864_v54 = vld [vmem:[#allocation7 + $0x20] sm:$0xff]   ;;  %v865_v55 = vld [vmem:[#allocation7 + $0x18] sm:$0xff]   ;;  %v866_v5 = vld [vmem:[#allocation7 + $0x10] sm:$0xff]  }
  0x3c   :  { %753 = vmatprep.subr.bf16.mxu1 %v961_v0  ;;  %770 = vmatpush3.bf16.msra.mxu0 %v846_v12  ;;  %v667_v56 = vld [vmem:[%s1120_s6] ss:$0 sm:$0xff] }
  0x3d   :  { %771 = vmatprep.subr.bf16.mxu0 %v961_v0 }
  0x3f   :  { %754 = vmatpush3.bf16.msra.mxu1 %v840_v6  ;;  %v867_v6 = vld [vmem:[#allocation7 + $0x8] sm:$0xff]  }
  0x40   :  { %755 = vmatprep.subr.bf16.mxu1 %v961_v0  ;;  %772 = vmatpush3.bf16.msra.mxu0 %v847_v13 }
  0x41   :  { %773 = vmatprep.subr.bf16.mxu0 %v961_v0 }
  0x43   :  { %756 = vmatpush3.bf16.msra.mxu1 %v841_v7  ;;  %v868_v7 = vld [vmem:[#allocation7] sm:$0xff]  }
  0x44   :  { %757 = vmatprep.subr.bf16.mxu1 %v961_v0  ;;  %774 = vmatpush3.bf16.msra.mxu0 %v848_v14 }
  0x45   :  { %775 = vmatprep.subr.bf16.mxu0 %v961_v0 }
  0x47   :  { %758 = vmatpush3.bf16.msra.mxu1 %v842_v8  ;;  %v676_v8 = vld [vmem:[%s1122_s8] ss:$0 sm:$0xff] }
  0x48   :  { %759 = vmatprep.subr.bf16.mxu1 %v961_v0  ;;  %776 = vmatpush3.bf16.msra.mxu0 %v849_v15 }
  0x49   :  { %777 = vmatprep.subr.bf16.mxu0 %v961_v0 }
  0x4b   :  { %760 = vmatpush3.bf16.msra.mxu1 %v843_v9 }
  0x4c   :  { %761 = vmatprep.subr.bf16.mxu1 %v961_v0  ;;  %778 = vmatpush3.bf16.msra.mxu0 %v850_v28 }
  0x4d   :  { %779 = vmatprep.subr.bf16.mxu0 %v961_v0 }
  0x4f   :  { %762 = vmatpush3.bf16.msra.mxu1 %v844_v10 }
  0x50   :  { %787 = vmatprep.subr.bf16.mxu1 %v961_v0  ;;  %780 = vmatpush3.bf16.msra.mxu0 %v851_v29 }
  0x51   :  { %781 = vmatprep.subr.bf16.mxu0 %v961_v0 }
  0x54   :  { %782 = vmatpush3.bf16.msra.mxu0 %v852_v30 }
  0x55   :  { %807 = vmatprep.subr.bf16.mxu0 %v961_v0 }
  0xf6   :  { %v154_v17 = vpop.f32.mrf.mxu0 }
  0xf7   :  { %v155_v18 = vadd.f32 %v654_v16, %v154_v17 }
  0xf8   :  { %v745_v19 = vpop.f32.mrf.mxu0 }
  0xf9   :  { %v163_v21 = vmul.f32 0.01, %v155_v18  ;;  %vm161_vm2 = vcmp.gt.f32.partialorder %v155_v18, 0.0 }
  0xfa   :  { %v157_v20 = vpop.f32.mrf.mxu0 }
  0xfb   :  { %v158_v22 = vadd.f32 %v654_v16, %v157_v20  ;;  %v165_v25 = vsel %vm161_vm2, %v155_v18, %v163_v21  ;;  %v685_v20 = vld [vmem:[%s1124_s10] ss:$0 sm:$0xff] }
  0xfc   :  { %v746_v23 = vpop.f32.mrf.mxu0 }
  0xfd   :  { %vm162_vm3 = vcmp.gt.f32.partialorder %v158_v22, 0.0  ;;  %v164_v24 = vmul.f32 0.01, %v158_v22 }
  0xff   :  { %v166_v26 = vsel %vm162_vm3, %v158_v22, %v164_v24 }
 0x100   :  { %v167_v27 = vpack.c.bf16 %v166_v26, %v165_v25 }
 0x102   :  { %764 = vmatmul.mubr.bf16.vlgmr.msra.gmra.mxu1 %v167_v27 }
 0x103   :  { %803 = vmatprep.mubr.msk.bf16.mxu1 %vm962_vm0, %v961_v0  ;;  %788 = vmatpush3.bf16.msra.mxu1 %v853_v31 }
 0x104   :  { %789 = vmatprep.subr.bf16.mxu1 %v961_v0 }
 0x107   :  { %790 = vmatpush3.bf16.msra.mxu1 %v854_v32 }
 0x108   :  { %791 = vmatprep.subr.bf16.mxu1 %v961_v0 }
 0x10b   :  { %792 = vmatpush3.bf16.msra.mxu1 %v855_v33 }
 0x10c   :  { %793 = vmatprep.subr.bf16.mxu1 %v961_v0 }
 0x10f   :  { %794 = vmatpush3.bf16.msra.mxu1 %v856_v34 }
 0x110   :  { %795 = vmatprep.subr.bf16.mxu1 %v961_v0 }
 0x113   :  { %796 = vmatpush3.bf16.msra.mxu1 %v857_v35 }
 0x114   :  { %797 = vmatprep.subr.bf16.mxu1 %v961_v0 }
 0x117   :  { %798 = vmatpush3.bf16.msra.mxu1 %v858_v48 }
 0x118   :  { %799 = vmatprep.subr.bf16.mxu1 %v961_v0 }
 0x11b   :  { %800 = vmatpush3.bf16.msra.mxu1 %v859_v49 }
 0x11c   :  { %801 = vmatprep.subr.bf16.mxu1 %v961_v0 }
 0x11f   :  { %802 = vmatpush3.bf16.msra.mxu1 %v860_v50 }
 0x1c2   :  { %v273_v37 = vpop.f32.mrf.mxu1 }
 0x1c3   :  { %v274_v38 = vadd.f32 %v658_v36, %v273_v37 }
 0x1c4   :  { %v765_v39 = vpop.f32.mrf.mxu1 }
 0x1c5   :  { %v282_v41 = vmul.f32 0.01, %v274_v38  ;;  %vm280_vm4 = vcmp.gt.f32.partialorder %v274_v38, 0.0 }
 0x1c6   :  { %v276_v40 = vpop.f32.mrf.mxu1 }
 0x1c7   :  { %v277_v42 = vadd.f32 %v658_v36, %v276_v40  ;;  %v284_v45 = vsel %vm280_vm4, %v274_v38, %v282_v41 }
 0x1c8   :  { %v766_v43 = vpop.f32.mrf.mxu1 }
 0x1c9   :  { %vm281_vm5 = vcmp.gt.f32.partialorder %v277_v42, 0.0  ;;  %v283_v44 = vmul.f32 0.01, %v277_v42 }
 0x1cb   :  { %v285_v46 = vsel %vm281_vm5, %v277_v42, %v283_v44 }
 0x1cc   :  { %v286_v47 = vpack.c.bf16 %v285_v46, %v284_v45 }
 0x1ce   :  { %784 = vmatmul.mubr.bf16.vlgmr.msra.gmra.mxu0 %v286_v47 }
 0x1cf   :  { %823 = vmatprep.mubr.msk.bf16.mxu0 %vm962_vm0, %v961_v0  ;;  %808 = vmatpush3.bf16.msra.mxu0 %v861_v51 }
 0x1d0   :  { %809 = vmatprep.subr.bf16.mxu0 %v961_v0 }
 0x1d3   :  { %810 = vmatpush3.bf16.msra.mxu0 %v862_v52 }
 0x1d4   :  { %811 = vmatprep.subr.bf16.mxu0 %v961_v0 }
 0x1d7   :  { %812 = vmatpush3.bf16.msra.mxu0 %v863_v53 }
 0x1d8   :  { %813 = vmatprep.subr.bf16.mxu0 %v961_v0 }
 0x1db   :  { %814 = vmatpush3.bf16.msra.mxu0 %v864_v54 }
 0x1dc   :  { %815 = vmatprep.subr.bf16.mxu0 %v961_v0 }
 0x1df   :  { %816 = vmatpush3.bf16.msra.mxu0 %v865_v55 }
 0x1e0   :  { %817 = vmatprep.subr.bf16.mxu0 %v961_v0 }
 0x1e3   :  { %818 = vmatpush3.bf16.msra.mxu0 %v866_v5 }
 0x1e4   :  { %819 = vmatprep.subr.bf16.mxu0 %v961_v0 }
 0x1e7   :  { %820 = vmatpush3.bf16.msra.mxu0 %v867_v6 }
 0x1e8   :  { %821 = vmatprep.subr.bf16.mxu0 %v961_v0 }
 0x1eb   :  { %822 = vmatpush3.bf16.msra.mxu0 %v868_v7 }
 0x28e   :  { %v392_v57 = vpop.f32.mrf.mxu0 }
 0x28f   :  { %v393_v58 = vadd.f32 %v667_v56, %v392_v57 }
 0x290   :  { %v785_v59 = vpop.f32.mrf.mxu0 }
 0x291   :  { %v401_v61 = vmul.f32 0.01, %v393_v58  ;;  %vm399_vm6 = vcmp.gt.f32.partialorder %v393_v58, 0.0 }
 0x292   :  { %v395_v60 = vpop.f32.mrf.mxu0 }
 0x293   :  { %v396_v62 = vadd.f32 %v667_v56, %v395_v60  ;;  %v403_v2 = vsel %vm399_vm6, %v393_v58, %v401_v61 }
 0x294   :  { %v786_v63 = vpop.f32.mrf.mxu0 }
 0x295   :  { %vm400_vm7 = vcmp.gt.f32.partialorder %v396_v62, 0.0  ;;  %v402_v1 = vmul.f32 0.01, %v396_v62 }
 0x297   :  { %v404_v3 = vsel %vm400_vm7, %v396_v62, %v402_v1 }
 0x298   :  { %v405_v4 = vpack.c.bf16 %v404_v3, %v403_v2 }
 0x29a   :  { %804 = vmatmul.mubr.bf16.vlgmr.msra.gmra.mxu1 %v405_v4 }
 0x35a   :  { %v511_v9 = vpop.f32.mrf.mxu1 }
 0x35b   :  { %v512_v10 = vadd.f32 %v676_v8, %v511_v9 }
 0x35c   :  { %v805_v11 = vpop.f32.mrf.mxu1 }
 0x35d   :  { %v520_v13 = vmul.f32 0.01, %v512_v10  ;;  %vm518_vm8 = vcmp.gt.f32.partialorder %v512_v10, 0.0 }
 0x35e   :  { %v514_v12 = vpop.f32.mrf.mxu1 }
 0x35f   :  { %v515_v14 = vadd.f32 %v676_v8, %v514_v12  ;;  %v522_v17 = vsel %vm518_vm8, %v512_v10, %v520_v13 }
 0x360   :  { %v806_v15 = vpop.f32.mrf.mxu1 }
 0x361   :  { %vm519_vm9 = vcmp.gt.f32.partialorder %v515_v14, 0.0  ;;  %v521_v16 = vmul.f32 0.01, %v515_v14 }
 0x363   :  { %v523_v18 = vsel %vm519_vm9, %v515_v14, %v521_v16 }
 0x364   :  { %v524_v19 = vpack.c.bf16 %v523_v18, %v522_v17 }
 0x366   :  { %824 = vmatmul.mubr.bf16.vlgmr.msra.gmra.mxu0 %v524_v19 }
 0x426   :  { %v630_v0 = vpop.f32.mrf.mxu0 }
 0x427   :  { %v631_v23 = vadd.f32 %v685_v20, %v630_v0 }
 0x428   :  { %v825_v21 = vpop.f32.mrf.mxu0 }
 0x42a   :  { %v633_v22 = vpop.f32.mrf.mxu0 }
 0x42b   :  { %v634_v24 = vadd.f32 %v685_v20, %v633_v22 }
 0x42c   :  { %v826_v25 = vpop.f32.mrf.mxu0 }
 0x42d   :  { %v701_v26 = vpack.c.bf16 %v634_v24, %v631_v23 }
 0x42f   :  { %702 = vst [vmem:[%s1125_s11] sm:$0xff] %v701_v26  }
 0x430   :  { %651 = vsyncpa [#allocation3], 1 }
 0x431   :  { %652 = vsyncpa [#allocation5], 1 }
 0x432   :  { %653 = vsyncpa [#allocation8], 1 }

</bundles_post_ra>
